<compile_context>
chip_gen: v6e
topology: v6e:2x2x1
jax: 0.10.0
libtpu: 0.0.40
codegen_flags: <defaults>
</compile_context>

<pallas_src>
import functools

import numpy as np
import jax
import jax.numpy as jnp
from jax.experimental import pallas as pl
from jax.experimental.pallas import tpu as pltpu


def _interp_matrix(out_size, in_size):
    """1-D bilinear interpolation matrix, align_corners=True (matches F.interpolate)."""
    m = np.zeros((out_size, in_size), np.float32)
    if out_size == 1 or in_size == 1:
        m[:, 0] = 1.0
        return m
    coords = np.arange(out_size, dtype=np.float64) * (in_size - 1) / (out_size - 1)
    lo = np.clip(np.floor(coords).astype(np.int64), 0, in_size - 1)
    hi = np.minimum(lo + 1, in_size - 1)
    frac = (coords - lo).astype(np.float32)
    rows = np.arange(out_size)
    m[rows, lo] += 1.0 - frac
    m[rows, hi] += frac
    return m


def _fused_loss_kernel(seg_ref, ww_t_ref, wh_ref, tgt_ref, cl_ref, ct_ref, out_ref,
                       *, num_classes, src_h_padded, ignore_label):
    C, Hs = num_classes, src_h_padded

    # ---- Stage 1: width interpolation, single MXU matmul with M = C*Hs (bf16 in, f32 acc) ----
    t1 = jnp.dot(seg_ref[0], ww_t_ref[...], preferred_element_type=jnp.float32)  # (C*Hs, W)
    t1 = t1.astype(jnp.bfloat16)
    W = t1.shape[1]

    wh = wh_ref[...]                                    # (tH, Hs) bf16 — this H-tile's rows
    tH = wh.shape[0]

    tgt = tgt_ref[0].astype(jnp.int32)                  # (tH, W); int8 in HBM, widened here
    valid = tgt != ignore_label

    # ---- Stage 2 + fused masked pixel CE: online log-sum-exp over classes ----
    # Per class one MXU matmul; no (C, tH, W) pred / exp / one-hot temporaries are kept.
    m = jnp.full((tH, W), -jnp.inf, jnp.float32)
    l = jnp.zeros((tH, W), jnp.float32)
    picked = jnp.zeros((tH, W), jnp.float32)
    for c in range(C):                                  # static unroll (C small)
        p_c = jnp.dot(wh, t1[c * Hs:(c + 1) * Hs, :],   # (tH, Hs) @ (Hs, W) -> (tH, W)
                      preferred_element_type=jnp.float32)
        m_new = jnp.maximum(m, p_c)
        l = l * jnp.exp(m - m_new) + jnp.exp(p_c - m_new)
        picked = jnp.where(tgt == c, p_c, picked)
        m = m_new
    per_pix = jnp.where(valid, m + jnp.log(l) - picked, 0.0)
    seg_sum = jnp.sum(per_pix, keepdims=True)                       # (1, 1)
    seg_cnt = jnp.sum(valid.astype(jnp.float32), keepdims=True)     # (1, 1)

    # ---- Contrast losses (PPL_a CE + PPL_b squared distance) on this step's row chunk ----
    cl = cl_ref[0]                                      # (Nb, Kp) f32, K lane-padded with -1e9
    ct = ct_ref[0]                                      # (Nb, 1)  int32
    cvalid = ct != ignore_label
    cvf = cvalid.astype(jnp.float32)
    ct_safe = jnp.where(cvalid, ct, 0)
    cm = jnp.max(cl, axis=1, keepdims=True)                                   # (Nb, 1)
    clse = cm + jnp.log(jnp.sum(jnp.exp(cl - cm), axis=1, keepdims=True))     # (Nb, 1)
    kiota = jax.lax.broadcasted_iota(jnp.int32, cl.shape, 1)
    cpicked = jnp.sum(jnp.where(kiota == ct_safe, cl, 0.0), axis=1, keepdims=True)
    ce_sum = jnp.sum((clse - cpicked) * cvf, keepdims=True)                   # (1, 1)
    ppd_sum = jnp.sum(((1.0 - cpicked) ** 2) * cvf, keepdims=True)            # (1, 1)
    c_cnt = jnp.sum(cvf, keepdims=True)                                       # (1, 1)

    # ---- Single merged output write: lanes [0..4] = seg_sum, seg_cnt, ce_sum, ppd_sum, c_cnt ----
    lane = jax.lax.broadcasted_iota(jnp.int32, (1, 1, 1, 8), 3)
    out = jnp.where(lane == 0, seg_sum, 0.0)
    out = jnp.where(lane == 1, seg_cnt, out)
    out = jnp.where(lane == 2, ce_sum, out)
    out = jnp.where(lane == 3, ppd_sum, out)
    out = jnp.where(lane == 4, c_cnt, out)
    out_ref[...] = out


def pixel_prototype_ce_loss(seg, target, contrast_logits, contrast_target, *,
                            ignore_label=-1,
                            loss_ppl_a_weight=0.01,
                            loss_ppl_b_weight=0.001):
    B, C, Hs, Ws = seg.shape
    _, H, W = target.shape

    # Pad Hs to a multiple of 8 so the in-kernel per-class slices are sublane-tile aligned
    # (padded rows are zero in seg and have zero weight in wh, so they contribute nothing).
    Hsp = -(-Hs // 8) * 8
    if Hsp != Hs:
        seg = jnp.pad(seg, ((0, 0), (0, 0), (0, Hsp - Hs), (0, 0)))

    # Separable 1-D bilinear weights (align_corners=True); bf16 inputs, f32 MXU accumulation.
    ww_t = jnp.asarray(_interp_matrix(W, Ws).T, dtype=jnp.bfloat16)          # (Ws, W)
    wh_np = _interp_matrix(H, Hs)                                            # (H, Hs)
    if Hsp != Hs:
        wh_np = np.pad(wh_np, ((0, 0), (0, Hsp - Hs)))
    wh = jnp.asarray(wh_np, dtype=jnp.bfloat16)                              # (H, Hsp)

    seg_flat = seg.reshape(B, C * Hsp, Ws).astype(jnp.bfloat16)

    # H-tiling (second, parallel grid axis): bounds per-step VMEM and feeds both v7x TCs.
    if H <= 256:
        tH = H
    else:
        tH = H
        for cand in (512, 256, 128, 64, 32):
            if H % cand == 0:
                tH = cand
                break
    nH = H // tH

    # Narrow target dtype (4x less DMA for the largest streamed input); widened in-kernel.
    if C <= 127 and -128 <= ignore_label <= 127:
        tgt_small = target.astype(jnp.int8)
    else:
        tgt_small = target.astype(jnp.int32)

    # Shard the (tiny) contrast rows across the whole (B, nH) grid; lane-pad K to 128 with a
    # large negative (exp ~ 0, never the argmax/target), row-pad with ignore-label rows.
    G = B * nH
    N, K = contrast_logits.shape
    Kp = -(-K // 128) * 128
    Nb = -(-N // G)
    Nb = -(-Nb // 8) * 8
    pad_rows = G * Nb - N
    cl = jnp.pad(contrast_logits.astype(jnp.float32),
                 ((0, pad_rows), (0, Kp - K)), constant_values=-1e9).reshape(G, Nb, Kp)
    ct = jnp.pad(contrast_target.astype(jnp.int32), ((0, pad_rows),),
                 constant_values=ignore_label).reshape(G, Nb, 1)

    kernel = functools.partial(_fused_loss_kernel, num_classes=C, src_h_padded=Hsp,
                               ignore_label=ignore_label)
    out = pl.pallas_call(
        kernel,
        out_shape=jax.ShapeDtypeStruct((B, nH, 1, 8), jnp.float32),
        grid=(B, nH),
        in_specs=[
            pl.BlockSpec((1, C * Hsp, Ws), lambda b, j: (b, 0, 0)),
            pl.BlockSpec((Ws, W), lambda b, j: (0, 0)),
            pl.BlockSpec((tH, Hsp), lambda b, j: (j, 0)),
            pl.BlockSpec((1, tH, W), lambda b, j: (b, j, 0)),
            pl.BlockSpec((1, Nb, Kp), lambda b, j: (b * nH + j, 0, 0)),
            pl.BlockSpec((1, Nb, 1), lambda b, j: (b * nH + j, 0, 0)),
        ],
        out_specs=pl.BlockSpec((1, 1, 1, 8), lambda b, j: (b, j, 0, 0)),
        compiler_params=pltpu.CompilerParams(
            dimension_semantics=("parallel", "parallel"),
            vmem_limit_bytes=48 * 1024 * 1024),
    )(seg_flat, ww_t, wh, tgt_small, cl, ct)

    stats = jnp.sum(out.reshape(-1, 8), axis=0)
    seg_loss = stats[0] / stats[1]      # FSCELoss: mean CE over non-ignored pixels
    loss_ppc = stats[2] / stats[4]      # PPL_a: mean CE over non-ignored contrast rows
    loss_ppd = stats[3] / stats[4]      # PPL_b: mean squared (1 - picked logit)
    return seg_loss + loss_ppl_a_weight * loss_ppc + loss_ppl_b_weight * loss_ppd


if __name__ == "__main__":
    key = jax.random.PRNGKey(0)
    B, C, Hs, Ws, H, W = 2, 4, 8, 8, 16, 16
    NUM_PROTOS = 5
    K = C * NUM_PROTOS     # contrast logits over (class x prototype)
    N = 16                 # number of contrast samples (pixels)

    k1, k2, k3, k4, k5 = jax.random.split(key, 5)
    seg = jax.random.normal(k1, (B, C, Hs, Ws), jnp.float32)            # preds['seg']
    target = jax.random.randint(k2, (B, H, W), 0, C)
    ignore_mask = jax.random.uniform(k3, (B, H, W)) < 0.1
    target = jnp.where(ignore_mask, -1, target).astype(jnp.int32)       # ground-truth labels
    contrast_logits = jax.random.normal(k4, (N, K), jnp.float32)        # preds['logits']
    contrast_target = jax.random.randint(k5, (N,), 0, K)
    contrast_target = contrast_target.at[0].set(-1).astype(jnp.int32)   # preds['target']

    loss = pixel_prototype_ce_loss(seg, target, contrast_logits, contrast_target)
    jax.block_until_ready(loss)
    print("KERNEL_OK")
</pallas_src>

<mosaic_0001>
module attributes {stable_mosaic.version = 11 : i64} {
  func.func @_fused_loss_kernel(%arg0: i32, %arg1: i32, %arg2: memref<1x32x8xbf16, #tpu.memory_space<vmem>>, %arg3: memref<8x16xbf16, #tpu.memory_space<vmem>>, %arg4: memref<16x8xbf16, #tpu.memory_space<vmem>>, %arg5: memref<1x16x16xi8, #tpu.memory_space<vmem>>, %arg6: memref<1x8x128xf32, #tpu.memory_space<vmem>>, %arg7: memref<1x8x1xi32, #tpu.memory_space<vmem>>, %arg8: memref<1x1x1x8xf32, #tpu.memory_space<vmem>>) attributes {dimension_semantics = [#tpu.dimension_semantics<parallel>, #tpu.dimension_semantics<parallel>], iteration_bounds = array<i64: 2, 1>, scalar_prefetch = 0 : i64, scratch_operands = 0 : i64, tpu.core_type = #tpu.core_type<tc>, window_params = [{transform_indices = @transform_0, window_bounds = array<i64: 1, 32, 8>}, {pipeline_mode = #tpu.pipeline_mode<synchronous>, transform_indices = @transform_1, window_bounds = array<i64: 8, 16>}, {transform_indices = @transform_2, window_bounds = array<i64: 16, 8>}, {transform_indices = @transform_3, window_bounds = array<i64: 1, 16, 16>}, {transform_indices = @transform_4, window_bounds = array<i64: 1, 8, 128>}, {transform_indices = @transform_5, window_bounds = array<i64: 1, 8, 1>}, {transform_indices = @transform_6, window_bounds = array<i64: 1, 1, 1, 8>}]} {
    %c0 = arith.constant 0 : index
    %c0_0 = arith.constant 0 : index
    %c0_1 = arith.constant 0 : index
    %0 = vector.load %arg2[%c0, %c0_0, %c0_1] : memref<1x32x8xbf16, #tpu.memory_space<vmem>>, vector<1x32x8xbf16>
    %1 = vector.shape_cast %0 : vector<1x32x8xbf16> to vector<32x8xbf16>
    %c0_2 = arith.constant 0 : index
    %c0_3 = arith.constant 0 : index
    %2 = vector.load %arg3[%c0_2, %c0_3] : memref<8x16xbf16, #tpu.memory_space<vmem>>, vector<8x16xbf16>
    %cst = arith.constant dense<0.000000e+00> : vector<32x16xf32>
    %3 = tpu.matmul %1, %2, %cst {dimension_numbers = #tpu.dot_dimension_numbers<[1], [0], [0], [1], [0, 0, 1, 1], [], []>} : vector<32x8xbf16>, vector<8x16xbf16>, vector<32x16xf32> -> vector<32x16xf32>
    %4 = arith.truncf %3 : vector<32x16xf32> to vector<32x16xbf16>
    %c0_4 = arith.constant 0 : index
    %c0_5 = arith.constant 0 : index
    %5 = vector.load %arg4[%c0_4, %c0_5] : memref<16x8xbf16, #tpu.memory_space<vmem>>, vector<16x8xbf16>
    %c0_6 = arith.constant 0 : index
    %c0_7 = arith.constant 0 : index
    %c0_8 = arith.constant 0 : index
    %6 = vector.load %arg5[%c0_6, %c0_7, %c0_8] : memref<1x16x16xi8, #tpu.memory_space<vmem>>, vector<1x16x16xi8>
    %7 = vector.shape_cast %6 : vector<1x16x16xi8> to vector<16x16xi8>
    %8 = arith.extsi %7 : vector<16x16xi8> to vector<16x16xi32>
    %c-1_i32 = arith.constant -1 : i32
    %9 = vector.broadcast %c-1_i32 : i32 to vector<16x16xi32>
    %10 = arith.cmpi ne, %8, %9 : vector<16x16xi32>
    %cst_9 = arith.constant 0xFF800000 : f32
    %11 = vector.broadcast %cst_9 : f32 to vector<16x16xf32>
    %cst_10 = arith.constant 0.000000e+00 : f32
    %12 = vector.broadcast %cst_10 : f32 to vector<16x16xf32>
    %cst_11 = arith.constant 0.000000e+00 : f32
    %13 = vector.broadcast %cst_11 : f32 to vector<16x16xf32>
    %14 = vector.extract_strided_slice %4 {offsets = [0, 0], sizes = [8, 16], strides = [1, 1]} : vector<32x16xbf16> to vector<8x16xbf16>
    %cst_12 = arith.constant dense<0.000000e+00> : vector<16x16xf32>
    %15 = tpu.matmul %5, %14, %cst_12 {dimension_numbers = #tpu.dot_dimension_numbers<[1], [0], [0], [1], [0, 0, 1, 1], [], []>} : vector<16x8xbf16>, vector<8x16xbf16>, vector<16x16xf32> -> vector<16x16xf32>
    %16 = arith.maximumf %11, %15 : vector<16x16xf32>
    %17 = arith.subf %11, %16 : vector<16x16xf32>
    %18 = math.exp %17 : vector<16x16xf32>
    %19 = arith.mulf %12, %18 : vector<16x16xf32>
    %20 = arith.subf %15, %16 : vector<16x16xf32>
    %21 = math.exp %20 : vector<16x16xf32>
    %22 = arith.addf %19, %21 : vector<16x16xf32>
    %c0_i32 = arith.constant 0 : i32
    %23 = vector.broadcast %c0_i32 : i32 to vector<16x16xi32>
    %24 = arith.cmpi eq, %8, %23 : vector<16x16xi32>
    %25 = arith.select %24, %15, %13 : vector<16x16xi1>, vector<16x16xf32>
    %26 = vector.extract_strided_slice %4 {offsets = [8, 0], sizes = [8, 16], strides = [1, 1]} : vector<32x16xbf16> to vector<8x16xbf16>
    %cst_13 = arith.constant dense<0.000000e+00> : vector<16x16xf32>
    %27 = tpu.matmul %5, %26, %cst_13 {dimension_numbers = #tpu.dot_dimension_numbers<[1], [0], [0], [1], [0, 0, 1, 1], [], []>} : vector<16x8xbf16>, vector<8x16xbf16>, vector<16x16xf32> -> vector<16x16xf32>
    %28 = arith.maximumf %16, %27 : vector<16x16xf32>
    %29 = arith.subf %16, %28 : vector<16x16xf32>
    %30 = math.exp %29 : vector<16x16xf32>
    %31 = arith.mulf %22, %30 : vector<16x16xf32>
    %32 = arith.subf %27, %28 : vector<16x16xf32>
    %33 = math.exp %32 : vector<16x16xf32>
    %34 = arith.addf %31, %33 : vector<16x16xf32>
    %c1_i32 = arith.constant 1 : i32
    %35 = vector.broadcast %c1_i32 : i32 to vector<16x16xi32>
    %36 = arith.cmpi eq, %8, %35 : vector<16x16xi32>
    %37 = arith.select %36, %27, %25 : vector<16x16xi1>, vector<16x16xf32>
    %38 = vector.extract_strided_slice %4 {offsets = [16, 0], sizes = [8, 16], strides = [1, 1]} : vector<32x16xbf16> to vector<8x16xbf16>
    %cst_14 = arith.constant dense<0.000000e+00> : vector<16x16xf32>
    %39 = tpu.matmul %5, %38, %cst_14 {dimension_numbers = #tpu.dot_dimension_numbers<[1], [0], [0], [1], [0, 0, 1, 1], [], []>} : vector<16x8xbf16>, vector<8x16xbf16>, vector<16x16xf32> -> vector<16x16xf32>
    %40 = arith.maximumf %28, %39 : vector<16x16xf32>
    %41 = arith.subf %28, %40 : vector<16x16xf32>
    %42 = math.exp %41 : vector<16x16xf32>
    %43 = arith.mulf %34, %42 : vector<16x16xf32>
    %44 = arith.subf %39, %40 : vector<16x16xf32>
    %45 = math.exp %44 : vector<16x16xf32>
    %46 = arith.addf %43, %45 : vector<16x16xf32>
    %c2_i32 = arith.constant 2 : i32
    %47 = vector.broadcast %c2_i32 : i32 to vector<16x16xi32>
    %48 = arith.cmpi eq, %8, %47 : vector<16x16xi32>
    %49 = arith.select %48, %39, %37 : vector<16x16xi1>, vector<16x16xf32>
    %50 = vector.extract_strided_slice %4 {offsets = [24, 0], sizes = [8, 16], strides = [1, 1]} : vector<32x16xbf16> to vector<8x16xbf16>
    %cst_15 = arith.constant dense<0.000000e+00> : vector<16x16xf32>
    %51 = tpu.matmul %5, %50, %cst_15 {dimension_numbers = #tpu.dot_dimension_numbers<[1], [0], [0], [1], [0, 0, 1, 1], [], []>} : vector<16x8xbf16>, vector<8x16xbf16>, vector<16x16xf32> -> vector<16x16xf32>
    %52 = arith.maximumf %40, %51 : vector<16x16xf32>
    %53 = arith.subf %40, %52 : vector<16x16xf32>
    %54 = math.exp %53 : vector<16x16xf32>
    %55 = arith.mulf %46, %54 : vector<16x16xf32>
    %56 = arith.subf %51, %52 : vector<16x16xf32>
    %57 = math.exp %56 : vector<16x16xf32>
    %58 = arith.addf %55, %57 : vector<16x16xf32>
    %c3_i32 = arith.constant 3 : i32
    %59 = vector.broadcast %c3_i32 : i32 to vector<16x16xi32>
    %60 = arith.cmpi eq, %8, %59 : vector<16x16xi32>
    %61 = arith.select %60, %51, %49 : vector<16x16xi1>, vector<16x16xf32>
    %62 = math.log %58 : vector<16x16xf32>
    %63 = arith.addf %52, %62 : vector<16x16xf32>
    %64 = arith.subf %63, %61 : vector<16x16xf32>
    %cst_16 = arith.constant 0.000000e+00 : f32
    %65 = vector.broadcast %cst_16 : f32 to vector<16x16xf32>
    %66 = arith.select %10, %64, %65 : vector<16x16xi1>, vector<16x16xf32>
    %67 = vector.shape_cast %66 : vector<16x16xf32> to vector<1x16x16xf32>
    %cst_17 = arith.constant dense<0.000000e+00> : vector<1xf32>
    %68 = vector.multi_reduction <add>, %67, %cst_17 [1, 2] : vector<1x16x16xf32> to vector<1xf32>
    %69 = vector.shape_cast %68 : vector<1xf32> to vector<1x1x1xf32>
    %70 = vector.extract %69[0, 0, 0] : f32 from vector<1x1x1xf32>
    %71 = vector.broadcast %70 : f32 to vector<1x1xf32>
    %72 = arith.extui %10 : vector<16x16xi1> to vector<16x16xi32>
    %73 = arith.sitofp %72 : vector<16x16xi32> to vector<16x16xf32>
    %74 = vector.shape_cast %73 : vector<16x16xf32> to vector<1x16x16xf32>
    %cst_18 = arith.constant dense<0.000000e+00> : vector<1xf32>
    %75 = vector.multi_reduction <add>, %74, %cst_18 [1, 2] : vector<1x16x16xf32> to vector<1xf32>
    %76 = vector.shape_cast %75 : vector<1xf32> to vector<1x1x1xf32>
    %77 = vector.extract %76[0, 0, 0] : f32 from vector<1x1x1xf32>
    %78 = vector.broadcast %77 : f32 to vector<1x1xf32>
    %c0_19 = arith.constant 0 : index
    %c0_20 = arith.constant 0 : index
    %c0_21 = arith.constant 0 : index
    %79 = vector.load %arg6[%c0_19, %c0_20, %c0_21] : memref<1x8x128xf32, #tpu.memory_space<vmem>>, vector<1x8x128xf32>
    %80 = vector.shape_cast %79 : vector<1x8x128xf32> to vector<8x128xf32>
    %c0_22 = arith.constant 0 : index
    %c0_23 = arith.constant 0 : index
    %c0_24 = arith.constant 0 : index
    %81 = vector.load %arg7[%c0_22, %c0_23, %c0_24] : memref<1x8x1xi32, #tpu.memory_space<vmem>>, vector<1x8x1xi32>
    %82 = vector.shape_cast %81 : vector<1x8x1xi32> to vector<8x1xi32>
    %c-1_i32_25 = arith.constant -1 : i32
    %83 = vector.broadcast %c-1_i32_25 : i32 to vector<8x1xi32>
    %84 = arith.cmpi ne, %82, %83 : vector<8x1xi32>
    %85 = arith.extui %84 : vector<8x1xi1> to vector<8x1xi32>
    %86 = arith.sitofp %85 : vector<8x1xi32> to vector<8x1xf32>
    %c0_i32_26 = arith.constant 0 : i32
    %87 = vector.broadcast %c0_i32_26 : i32 to vector<8x1xi32>
    %88 = arith.select %84, %82, %87 : vector<8x1xi1>, vector<8x1xi32>
    %cst_27 = arith.constant dense<0xFF800000> : vector<8xf32>
    %89 = vector.multi_reduction <maximumf>, %80, %cst_27 [1] : vector<8x128xf32> to vector<8xf32>
    %90 = vector.shape_cast %89 : vector<8xf32> to vector<8x1xf32>
    %91 = vector.broadcast %90 : vector<8x1xf32> to vector<8x128xf32>
    %92 = arith.subf %80, %91 : vector<8x128xf32>
    %93 = math.exp %92 : vector<8x128xf32>
    %cst_28 = arith.constant dense<0.000000e+00> : vector<8xf32>
    %94 = vector.multi_reduction <add>, %93, %cst_28 [1] : vector<8x128xf32> to vector<8xf32>
    %95 = vector.shape_cast %94 : vector<8xf32> to vector<8x1xf32>
    %96 = math.log %95 : vector<8x1xf32>
    %97 = arith.addf %90, %96 : vector<8x1xf32>
    %98 = tpu.iota {dimensions = array<i32: 1>} : vector<8x128xi32>
    %99 = vector.broadcast %88 : vector<8x1xi32> to vector<8x128xi32>
    %100 = arith.cmpi eq, %98, %99 : vector<8x128xi32>
    %cst_29 = arith.constant 0.000000e+00 : f32
    %101 = vector.broadcast %cst_29 : f32 to vector<8x128xf32>
    %102 = arith.select %100, %80, %101 : vector<8x128xi1>, vector<8x128xf32>
    %cst_30 = arith.constant dense<0.000000e+00> : vector<8xf32>
    %103 = vector.multi_reduction <add>, %102, %cst_30 [1] : vector<8x128xf32> to vector<8xf32>
    %104 = vector.shape_cast %103 : vector<8xf32> to vector<8x1xf32>
    %105 = arith.subf %97, %104 : vector<8x1xf32>
    %106 = arith.mulf %105, %86 : vector<8x1xf32>
    %107 = vector.shape_cast %106 : vector<8x1xf32> to vector<1x8x1xf32>
    %cst_31 = arith.constant dense<0.000000e+00> : vector<1xf32>
    %108 = vector.multi_reduction <add>, %107, %cst_31 [1, 2] : vector<1x8x1xf32> to vector<1xf32>
    %109 = vector.shape_cast %108 : vector<1xf32> to vector<1x1x1xf32>
    %110 = vector.extract %109[0, 0, 0] : f32 from vector<1x1x1xf32>
    %111 = vector.broadcast %110 : f32 to vector<1x1xf32>
    %cst_32 = arith.constant 1.000000e+00 : f32
    %112 = vector.broadcast %cst_32 : f32 to vector<8x1xf32>
    %113 = arith.subf %112, %104 : vector<8x1xf32>
    %114 = arith.mulf %113, %113 : vector<8x1xf32>
    %115 = arith.mulf %114, %86 : vector<8x1xf32>
    %116 = vector.shape_cast %115 : vector<8x1xf32> to vector<1x8x1xf32>
    %cst_33 = arith.constant dense<0.000000e+00> : vector<1xf32>
    %117 = vector.multi_reduction <add>, %116, %cst_33 [1, 2] : vector<1x8x1xf32> to vector<1xf32>
    %118 = vector.shape_cast %117 : vector<1xf32> to vector<1x1x1xf32>
    %119 = vector.extract %118[0, 0, 0] : f32 from vector<1x1x1xf32>
    %120 = vector.broadcast %119 : f32 to vector<1x1xf32>
    %121 = vector.shape_cast %86 : vector<8x1xf32> to vector<1x8x1xf32>
    %cst_34 = arith.constant dense<0.000000e+00> : vector<1xf32>
    %122 = vector.multi_reduction <add>, %121, %cst_34 [1, 2] : vector<1x8x1xf32> to vector<1xf32>
    %123 = vector.shape_cast %122 : vector<1xf32> to vector<1x1x1xf32>
    %124 = vector.extract %123[0, 0, 0] : f32 from vector<1x1x1xf32>
    %125 = vector.broadcast %124 : f32 to vector<1x1xf32>
    %126 = tpu.iota {dimensions = array<i32: 3>} : vector<1x1x1x8xi32>
    %c0_i32_35 = arith.constant 0 : i32
    %127 = vector.broadcast %c0_i32_35 : i32 to vector<1x1x1x8xi32>
    %128 = arith.cmpi eq, %126, %127 : vector<1x1x1x8xi32>
    %cst_36 = arith.constant 0.000000e+00 : f32
    %129 = vector.shape_cast %71 : vector<1x1xf32> to vector<1x1x1x1xf32>
    %130 = vector.broadcast %129 : vector<1x1x1x1xf32> to vector<1x1x1x8xf32>
    %131 = vector.broadcast %cst_36 : f32 to vector<1x1x1x8xf32>
    %132 = arith.select %128, %130, %131 : vector<1x1x1x8xi1>, vector<1x1x1x8xf32>
    %c1_i32_37 = arith.constant 1 : i32
    %133 = vector.broadcast %c1_i32_37 : i32 to vector<1x1x1x8xi32>
    %134 = arith.cmpi eq, %126, %133 : vector<1x1x1x8xi32>
    %135 = vector.shape_cast %78 : vector<1x1xf32> to vector<1x1x1x1xf32>
    %136 = vector.broadcast %135 : vector<1x1x1x1xf32> to vector<1x1x1x8xf32>
    %137 = arith.select %134, %136, %132 : vector<1x1x1x8xi1>, vector<1x1x1x8xf32>
    %c2_i32_38 = arith.constant 2 : i32
    %138 = vector.broadcast %c2_i32_38 : i32 to vector<1x1x1x8xi32>
    %139 = arith.cmpi eq, %126, %138 : vector<1x1x1x8xi32>
    %140 = vector.shape_cast %111 : vector<1x1xf32> to vector<1x1x1x1xf32>
    %141 = vector.broadcast %140 : vector<1x1x1x1xf32> to vector<1x1x1x8xf32>
    %142 = arith.select %139, %141, %137 : vector<1x1x1x8xi1>, vector<1x1x1x8xf32>
    %c3_i32_39 = arith.constant 3 : i32
    %143 = vector.broadcast %c3_i32_39 : i32 to vector<1x1x1x8xi32>
    %144 = arith.cmpi eq, %126, %143 : vector<1x1x1x8xi32>
    %145 = vector.shape_cast %120 : vector<1x1xf32> to vector<1x1x1x1xf32>
    %146 = vector.broadcast %145 : vector<1x1x1x1xf32> to vector<1x1x1x8xf32>
    %147 = arith.select %144, %146, %142 : vector<1x1x1x8xi1>, vector<1x1x1x8xf32>
    %c4_i32 = arith.constant 4 : i32
    %148 = vector.broadcast %c4_i32 : i32 to vector<1x1x1x8xi32>
    %149 = arith.cmpi eq, %126, %148 : vector<1x1x1x8xi32>
    %150 = vector.shape_cast %125 : vector<1x1xf32> to vector<1x1x1x1xf32>
    %151 = vector.broadcast %150 : vector<1x1x1x1xf32> to vector<1x1x1x8xf32>
    %152 = arith.select %149, %151, %147 : vector<1x1x1x8xi1>, vector<1x1x1x8xf32>
    %c0_40 = arith.constant 0 : index
    %c0_41 = arith.constant 0 : index
    %c0_42 = arith.constant 0 : index
    %c0_43 = arith.constant 0 : index
    %153 = vector.load %arg8[%c0_40, %c0_41, %c0_42, %c0_43] : memref<1x1x1x8xf32, #tpu.memory_space<vmem>>, vector<1x1x1x8xf32>
    tpu.vector_store %arg8[%c0_40, %c0_41, %c0_42, %c0_43], %152 {strides = array<i32>} : memref<1x1x1x8xf32, #tpu.memory_space<vmem>>, vector<1x1x1x8xf32>,
    return
  }
  func.func @transform_0(%arg0: i32, %arg1: i32) -> (i32, i32, i32) {
    %c0_i32 = arith.constant 0 : i32
    %c0_i32_0 = arith.constant 0 : i32
    %c0_i32_1 = arith.constant 0 : i32
    return %arg0, %c0_i32, %c0_i32_0 : i32, i32, i32
  }
  func.func @transform_1(%arg0: i32, %arg1: i32) -> (i32, i32) {
    %c0_i32 = arith.constant 0 : i32
    %c0_i32_0 = arith.constant 0 : i32
    %c0_i32_1 = arith.constant 0 : i32
    return %c0_i32, %c0_i32_0 : i32, i32
  }
  func.func @transform_2(%arg0: i32, %arg1: i32) -> (i32, i32) {
    %c0_i32 = arith.constant 0 : i32
    %c0_i32_0 = arith.constant 0 : i32
    return %arg1, %c0_i32 : i32, i32
  }
  func.func @transform_3(%arg0: i32, %arg1: i32) -> (i32, i32, i32) {
    %c0_i32 = arith.constant 0 : i32
    %c0_i32_0 = arith.constant 0 : i32
    return %arg0, %arg1, %c0_i32 : i32, i32, i32
  }
  func.func @transform_4(%arg0: i32, %arg1: i32) -> (i32, i32, i32) {
    %c1_i32 = arith.constant 1 : i32
    %0 = arith.muli %arg0, %c1_i32 : i32
    %1 = arith.addi %0, %arg1 : i32
    %c0_i32 = arith.constant 0 : i32
    %c0_i32_0 = arith.constant 0 : i32
    %c0_i32_1 = arith.constant 0 : i32
    return %1, %c0_i32, %c0_i32_0 : i32, i32, i32
  }
  func.func @transform_5(%arg0: i32, %arg1: i32) -> (i32, i32, i32) {
    %c1_i32 = arith.constant 1 : i32
    %0 = arith.muli %arg0, %c1_i32 : i32
    %1 = arith.addi %0, %arg1 : i32
    %c0_i32 = arith.constant 0 : i32
    %c0_i32_0 = arith.constant 0 : i32
    %c0_i32_1 = arith.constant 0 : i32
    return %1, %c0_i32, %c0_i32_0 : i32, i32, i32
  }
  func.func @transform_6(%arg0: i32, %arg1: i32) -> (i32, i32, i32, i32) {
    %c0_i32 = arith.constant 0 : i32
    %c0_i32_0 = arith.constant 0 : i32
    %c0_i32_1 = arith.constant 0 : i32
    return %arg0, %arg1, %c0_i32, %c0_i32_0 : i32, i32, i32, i32
  }
}

</mosaic_0001>

<bundles_post_ra>
// kernel: tpu_custom_call.1
= control target key start
LH: loop header
LB: loop body
LE: loop exit
PB: predicated region body
PF: predicated region fallthrough
CT: control target
= control target key end

     0   :  { %11 = vsyncpa [#allocation3], 0  ;;  %s1542_s0 = inlined_call_operand.vmem [shape: bf16[2,32,8], index: 0, kind: input, shape index: {}]   ;;  %s1543_s1 = inlined_call_operand.vmem [shape: bf16[8,16], index: 1, kind: input, shape index: {}]   ;;  %s1544_s2 = inlined_call_operand.vmem [shape: bf16[16,8], index: 2, kind: input, shape index: {}]   ;;  %s1545_s3 = inlined_call_operand.vmem [shape: s8[2,16,16], index: 3, kind: input, shape index: {}]   ;;  %s1546_s4 = inlined_call_operand.vmem [shape: f32[2,8,128], index: 4, kind: input, shape index: {}]   ;;  %s1547_s5 = inlined_call_operand.vmem [shape: s32[2,8,1], index: 5, kind: input, shape index: {}]   ;;  %s1548_s6 = inlined_call_operand.hbm [shape: f32[2,1,1,8], index: 6, kind: output, shape index: {}]  }
   0x1   :  { %13 = vsyncpa [#allocation3 + $0x1], 0  ;;  %s1285_s21 = smov 0   ;;  %s1287_s22 = smov 0  }
   0x2   :  { %s1289_s23 = smov 0   ;;  %s1291_s24 = smov 0  }
   0x3   :  { %s1293_s25 = smov 0   ;;  %s1295_s26 = smov 0  }
   0x4 LB: > { %s981_s27 = sadd.s32 4294967295, %s1244_s26   ;;  %s982_s28 = sadd.s32 4294967294, %s1244_s26   ;;  %s1244_s26 = sphi %s1295_s26, %s19_s26   ;;  %s1240_s25 = sphi %s1293_s25, %s1555_s25   ;;  %s1236_s24 = sphi %s1291_s24, %s1554_s24   ;;  %s1232_s23 = sphi %s1289_s23, %s1553_s23   ;;  %s1228_s22 = sphi %s1287_s22, %s1552_s22   ;;  %s1224_s21 = sphi %s1285_s21, %s1551_s21  }
   0x5   : > { %s31_s29 = sadd.s32 1, %s1240_s25  ;;  %s197_s30 = sadd.s32 1, %s1232_s23 }
   0x6   : > { %p33_p0 = scmp.ge.s32.totalorder %s31_s29, 2  ;;  %p207_p1 = scmp.ne.s32.totalorder %s1232_s23, %s1228_s22 }
   0x7   : > { %p208_p2 = scmp.eq.s32.totalorder %s981_s27, 1  ;;  %p213_p3 = scmp.ne.s32.totalorder %s1228_s22, %s1224_s21 }
   0x8   : > { %s1557_s29 = smov (%p33_p0, %s31_s29), 0  ;;  %p214_p5 = scmp.eq.s32.totalorder %s982_s28, 1 }
   0x9   : > { %p1325_p4 = por %p208_p2, %p207_p1  ;;  %s192_s8 = ssub.s32 %s1240_s25, %s1557_s29 }
   0xa   : > { %p986_p6 = scmp.ge.s32.totalorder %s1244_s26, 1  ;;  %p195_p7 = scmp.eq.s32.totalorder %s192_s8, 0 }
   0xb   : > { %p1332_p8 = por %p214_p5, %p213_p3  ;;  %p283_p9 = scmp.lt.s32.totalorder %s1244_s26, 3 }
   0xc   : > { %s1338_s10 = scalar_select %p195_p7, %s1232_s23, %s197_s30  }
   0xd   : > { %p284_p10 = pnand %p986_p6, %p283_p9 }
   0xe   : > { %p336_p11 = scmp.lt.s32.totalorder (!%p284_p10), %s1236_s24, 1  ;;  %s1005_s20 = sshll.u32 (!%p284_p10), %s1236_s24, 4 }
   0xf   : > { %287 = sbr.rel (%p284_p10) target bundleno = 710 (0x2c6), region = 44  ;;  %s1249_s16 = smov (!%p284_p10), [#allocation2]  }
  0x14   : > { %v374_v0 = vld [vmem:[%s1543_s1] sm:$0xf]  ;;  %vm392_vm0 = vcmask 1043456   ;;  %v1246_v2 = vmov 0   ;;  %s1347_s13 = scalar_select %p336_p11, %s1236_s24, 1  ;;  %v1247_v3 = vmov 0.0   ;;  %v784_v12 = vlaneseq }
  0x15   : > { %1055 = vmatprep.subr.msk.bf16.mxu0 %vm392_vm0, %v374_v0  ;;  %v394_v1 = vsel %vm392_vm0, %v374_v0, 0  ;;  %1124 = vset.pattern.permute.xlu0 %v1246_v2  ;;  %vm385_vm1 = vcmask 64512   ;;  %vm1248_vm3 = vmmov 0   ;;  %vm739_vm7 = vcmask 130048   ;;  %v1127_v33 = vld [vmem:[%s1544_s2] sm:$0xff]  }
  0x16   : > { %1026 = vmatpush3.bf16.msra.mxu0 %v394_v1  ;;  %1031 = vmatprep.subr.bf16.mxu1 %v1247_v3  ;;  %s991_s14 = sshll.u32 %s1347_s13, 3  ;;  %s1008_s18 = sshll.u32 %s1347_s13, 4  ;;  %v1377_v13 = vand.u32 127, %v784_v12  ;;  %vm795_vm8 = vcmask 7168  }
  0x17   : > { %1037 = vmatprep.subr.bf16.mxu0 %v1247_v3  ;;  %s361_s17 = scalar_lea.vmem %s1546_s4, %s991_s14  ;;  %s340_s27 = scalar_lea.vmem %s1542_s0, %s1008_s18  ;;  %1033 = vmatprep.mubr.msk.bf16.mxu1 %vm1248_vm3, %v1247_v3 }
  0x18   : > { %v768_v4 = vld [vmem:[%s361_s17] sm:$0xff]  ;;  %v1126_v6 = vld [vmem:[%s340_s27 + $0x8] sm:$0xff]   ;;  %s367_s8 = scalar_lea.vmem %s1547_s5, %s991_s14  ;;  %s1009_s11 = sshll.u32 %s1347_s13, 2 }
  0x19   : > { %774 = vmax.xlane.f32.xlu0 %v768_v4  ;;  %v1125_v5 = vld [vmem:[%s340_s27] sm:$0xff]   ;;  %s355_s15 = scalar_lea.vmem %s1545_s3, %s1009_s11  ;;  %s334_s17 = sand.u32 1, %s1228_s22  }
  0x1a   : > { %1027 = vmatprep.mubr.msk.bf16.mxu0 %vm385_vm1, %v1125_v5  ;;  %v1364_v7 = vld [vmem:[%s367_s8] sm:$0xff]  ;;  %s335_s28 = scalar_lea.vmem [#allocation2], %s334_s17  ;;  %s1502_s14 = scalar_lea.hbm %s1548_s6, %s1005_s20 }
  0x1b   : > { %1028 = vmatmul.mubr.msk.bf16.vlgmr.msra.gmra.mxu0 %vm385_vm1, %v1126_v6  ;;  %vm770_vm2 = vcmp.ne.s32.totalorder %v1364_v7, 4294967295  ;;  %v1011_v17 = vld [vmem:[%s355_s15] sm:$0xf]   ;;  %s860_s30 = sshll.u32 %s335_s28, 4  ;;  %s847_s15 = scalar_lea.sflag [#allocation3], %s334_s17  ;;  %s861_s30 = int_to_ptr.vmem [resolvable:$true] %s860_s30 }
  0x1c   : > { %v773_v8 = vsel %vm770_vm2, %v1364_v7, 0  ;;  %1039 = vmatprep.mubr.msk.bf16.mxu0 %vm1248_vm3, %v1247_v3  ;;  %v1384_v18 = vunpack.c.0.s8 %v1011_v17  ;;  %v1386_v19 = vunpack.c.1.s8 %v1011_v17  ;;  %v1004_v41 = vsel %vm770_vm2, 1.0, %v1247_v3  ;;  %s1168_s13 = scalar_lea.vmem %s861_s30, 16 }
  0x1d   : > { %v1419_v51 = vsel %vm795_vm8, %v1004_v41, 0.0  ;;  %vm832_vm2 = vcmp.eq.s32.totalorder %v1377_v13, 1  ;;  %p1169_p12 = scmp.ne.s32.totalorder %s861_s30, %s1168_s13 }
  0x1e   : > { %vm453_vm5 = vcmp.ne.s32.totalorder %v1384_v18, 4294967295  ;;  %vm454_vm6 = vcmp.ne.s32.totalorder %v1386_v19, 4294967295  ;;  %vm523_vm9 = vcmp.eq.s32.totalorder %v1384_v18, 0  ;;  %vm591_vm10 = vcmp.eq.s32.totalorder %v1384_v18, 1 }
  0x1f   : > { %v1002_v20 = vsel %vm453_vm5, 1.0, %v1247_v3  ;;  %v1003_v21 = vsel %vm454_vm6, 1.0, %v1247_v3  ;;  %vm524_vm11 = vcmp.eq.s32.totalorder %v1386_v19, 0  ;;  %vm657_vm12 = vcmp.eq.s32.totalorder %v1384_v18, 2  ;;  %p1170_p13 = pnand %p1169_p12, %p1325_p4 }
  0x20   : > { %v756_v22 = vsel %vm739_vm7, %v1002_v20, 0.0  ;;  %v757_v23 = vsel %vm739_vm7, %v1003_v21, 0.0  ;;  %vm592_vm13 = vcmp.eq.s32.totalorder %v1386_v19, 1  ;;  %vm725_vm14 = vcmp.eq.s32.totalorder %v1384_v18, 3 }
  0x21   : > { %v758_v24 = vadd.f32 %v757_v23, %v756_v22  ;;  %vm658_vm15 = vcmp.eq.s32.totalorder %v1386_v19, 2  ;;  %p1171_p0 = pneg %p1170_p13 }
  0x2f   : > { %787 = vperm.xlu0 %1124, %v773_v8  }
  0xa2   : > { %v1374_v9 = vpop.xlane.xlu0 %774 }
  0xa3   : > { %v776_v10 = vsub.f32 %v768_v4, %v1374_v9 }
  0xa5   : > { %v777_v11 = vmul.f32 1.442695, %v776_v10 }
  0xa7   : > { %1128 = vpow2.f32 %v777_v11 }
  0xaa   : > { %v788_v14 = vpop.permute.xlu0 %787 }
  0xab   : > { %vm789_vm4 = vcmp.eq.s32.totalorder %v1377_v13, %v788_v14 }
  0xac   : > { %v790_v16 = vsel %vm789_vm4, %v768_v4, 0.0  ;;  %vm838_vm4 = vcmp.eq.s32.totalorder %v1377_v13, 3 }
  0xb4   : > { %v1129_v15 = vpop.eup %1128 }
  0xb5   : > { %779 = vadd.xlane.f32.xlu1 %v1129_v15 }
  0xb9   : > { %791 = vadd.xlane.f32.xlu1 %v790_v16 }
  0xbd   : > { %759 = vadd.xlane.f32.xlu1 %v758_v24 }
  0xdb   : > { %v1029_v25 = vpop.f32.mrf.mxu0 }
  0xdd   : > { %v430_v26 = vpop.f32.mrf.mxu0 }
  0xdf   : > { %v1030_v27 = vpop.f32.mrf.mxu0 }
  0xe0   : > { %v446_v29 = vpack.c.bf16 %v1030_v27, %v1029_v25 }
  0xe1   : > { %v433_v28 = vpop.f32.mrf.mxu0 }
  0xe2   : > { %v445_v30 = vpack.c.bf16 %v433_v28, %v430_v26  ;;  %v662_v34 = vrot.slane %v446_v29, 4  ;;  %v596_v36 = vsel %vm392_vm0, %v446_v29, 0 }
  0xe4   : > { %v528_v31 = vrot.slane %v445_v30, 4  ;;  %v464_v32 = vsel %vm392_vm0, %v445_v30, 0  ;;  %v664_v37 = vsel %vm392_vm0, %v662_v34, 0 }
  0xe5   : > { %1032 = vmatpush3.bf16.msra.mxu1 %v464_v32 }
  0xe6   : > { %v530_v35 = vsel %vm392_vm0, %v528_v31, 0  ;;  %1043 = vmatprep.subr.bf16.mxu1 %v1247_v3  ;;  %vm726_vm0 = vcmp.eq.s32.totalorder %v1386_v19, 3 }
  0xe7   : > { %1038 = vmatpush3.bf16.msra.mxu0 %v530_v35 }
  0xe8   : > { %1034 = vmatmul.mubr.msk.bf16.vlgmr.msra.gmra.mxu1 %vm385_vm1, %v1127_v33  ;;  %1049 = vmatprep.subr.bf16.mxu0 %v1247_v3 }
  0xe9   : > { %1044 = vmatpush3.bf16.msra.mxu1 %v596_v36  ;;  %1045 = vmatprep.mubr.msk.bf16.mxu1 %vm1248_vm3, %v1247_v3 }
  0xea   : > { %1040 = vmatmul.mubr.msk.bf16.vlgmr.msra.gmra.mxu0 %vm385_vm1, %v1127_v33 }
  0xeb   : > { %1050 = vmatpush3.bf16.msra.mxu0 %v664_v37  ;;  %1051 = vmatprep.mubr.msk.bf16.mxu0 %vm1248_vm3, %v1247_v3  ;;  %vm835_vm3 = vcmp.eq.s32.totalorder %v1377_v13, 2 }
  0xf0   : > { %1046 = vmatmul.mubr.msk.bf16.vlgmr.msra.gmra.mxu1 %vm385_vm1, %v1127_v33 }
  0xf2   : > { %1052 = vmatmul.mubr.msk.bf16.vlgmr.msra.gmra.mxu0 %vm385_vm1, %v1127_v33  ;;  %vm829_vm1 = vcmp.eq.s32.totalorder %v1377_v13, 0 }
 0x13e   : > { %v780_v38 = vpop.xlane.xlu1 %779 }
 0x13f   : > { %1130 = vlog2.f32 %v780_v38 }
 0x142   : > { %v792_v39 = vpop.xlane.xlu1 %791 }
 0x143   : > { %v806_v40 = vsub.f32 1.0, %v792_v39 }
 0x145   : > { %v807_v42 = vmul.f32 %v806_v40, %v806_v40 }
 0x147   : > { %v808_v43 = vmul.f32 %v1004_v41, %v807_v42 }
 0x149   : > { %v809_v44 = vsel %vm795_vm8, %v808_v43, 0.0 }
 0x14a   : > { %810 = vadd.xlane.f32.xlu1 %v809_v44 }
 0x14c   : > { %v1131_v45 = vpop.eup %1130 }
 0x14d   : > { %v782_v46 = vmul.f32 0.6931472, %v1131_v45 }
 0x14f   : > { %v783_v47 = vadd.f32 %v782_v46, %v1374_v9 }
 0x151   : > { %v793_v48 = vsub.f32 %v783_v47, %v792_v39 }
 0x153   : > { %v794_v49 = vmul.f32 %v1004_v41, %v793_v48 }
 0x155   : > { %v796_v50 = vsel %vm795_vm8, %v794_v49, 0.0 }
 0x156   : > { %797 = vadd.xlane.f32.xlu1 %v796_v50 }
 0x1a8   : > { %v1421_v52 = vpop.f32.mrf.mxu1 }
 0x1a9   : > { %v507_v53 = vsub.f32 -inf, %v1421_v52  ;;  %v515_v54 = vsub.f32 %v1421_v52, %v1421_v52 }
 0x1aa   : > { %v1035_v55 = vpop.f32.mrf.mxu1  ;;  %v1426_v56 = vpop.f32.mrf.mxu0 }
 0x1ab   : > { %v509_v57 = vmul.f32 1.442695, %v507_v53  ;;  %v517_v58 = vmul.f32 1.442695, %v515_v54  ;;  %v573_v59 = vmax.f32 %v1421_v52, %v1426_v56 }
 0x1ac   : > { %v1430_v60 = vpop.f32.mrf.mxu1  ;;  %v1041_v61 = vpop.f32.mrf.mxu0 }
 0x1ad   : > { %1132 = vpow2.f32 %v509_v57  ;;  %v575_v62 = vsub.f32 %v1421_v52, %v573_v59  ;;  %v583_v63 = vsub.f32 %v1426_v56, %v573_v59  ;;  %v508_v0 = vsub.f32 -inf, %v1430_v60 }
 0x1ae   : > { %1134 = vpow2.f32 %v517_v58  ;;  %v516_v1 = vsub.f32 %v1430_v60, %v1430_v60  ;;  %v1036_v2 = vpop.f32.mrf.mxu1  ;;  %v1437_v3 = vpop.f32.mrf.mxu0 }
 0x1af   : > { %v577_v4 = vmul.f32 1.442695, %v575_v62  ;;  %v585_v5 = vmul.f32 1.442695, %v583_v63  ;;  %v511_v6 = vmul.f32 1.442695, %v508_v0  ;;  %v574_v7 = vmax.f32 %v1430_v60, %v1437_v3 }
 0x1b0   : > { %v519_v8 = vmul.f32 1.442695, %v516_v1  ;;  %v1042_v9 = vpop.f32.mrf.mxu0  ;;  %v1441_v10 = vpop.f32.mrf.mxu1 }
 0x1b1   : > { %1136 = vpow2.f32 %v577_v4  ;;  %v576_v11 = vsub.f32 %v1430_v60, %v574_v7  ;;  %v639_v12 = vmax.f32 %v573_v59, %v1441_v10  ;;  %v584_v14 = vsub.f32 %v1437_v3, %v574_v7 }
 0x1b2   : > { %1138 = vpow2.f32 %v585_v5  ;;  %v1047_v15 = vpop.f32.mrf.mxu1  ;;  %v1446_v16 = vpop.f32.mrf.mxu0 }
 0x1b3   : > { %1140 = vpow2.f32 %v511_v6  ;;  %v579_v17 = vmul.f32 1.442695, %v576_v11  ;;  %v641_v20 = vsub.f32 %v573_v59, %v639_v12  ;;  %v649_v21 = vsub.f32 %v1441_v10, %v639_v12 }
 0x1b4   : > { %1142 = vpow2.f32 %v519_v8  ;;  %v1450_v22 = vmax.f32 %v639_v12, %v1446_v16  ;;  %v1452_v23 = vpop.f32.mrf.mxu1  ;;  %v1053_v24 = vpop.f32.mrf.mxu0  ;;  %v587_v27 = vmul.f32 1.442695, %v584_v14 }
 0x1b5   : > { %1144 = vpow2.f32 %v579_v17  ;;  %v643_v25 = vmul.f32 1.442695, %v641_v20  ;;  %v640_v26 = vmax.f32 %v574_v7, %v1452_v23  ;;  %v651_v28 = vmul.f32 1.442695, %v649_v21 }
 0x1b6   : > { %v709_v29 = vsub.f32 %v639_v12, %v1450_v22  ;;  %v717_v30 = vsub.f32 %v1446_v16, %v1450_v22  ;;  %v1048_v31 = vpop.f32.mrf.mxu1  ;;  %v1458_v32 = vpop.f32.mrf.mxu0 }
 0x1b7   : > { %1146 = vpow2.f32 %v643_v25  ;;  %v642_v33 = vsub.f32 %v574_v7, %v640_v26  ;;  %v650_v34 = vsub.f32 %v1452_v23, %v640_v26  ;;  %v1462_v35 = vmax.f32 %v640_v26, %v1458_v32 }
 0x1b8   : > { %v711_v36 = vmul.f32 1.442695, %v709_v29  ;;  %v1054_v37 = vpop.f32.mrf.mxu0  ;;  %1148 = vpow2.f32 %v651_v28  ;;  %v719_v38 = vmul.f32 1.442695, %v717_v30  ;;  %v525_v25 = vsel %vm523_vm9, %v1421_v52, 0.0 }
 0x1b9   : > { %v645_v39 = vmul.f32 1.442695, %v642_v33  ;;  %v710_v40 = vsub.f32 %v640_v26, %v1462_v35  ;;  %1150 = vpow2.f32 %v587_v27  ;;  %v653_v42 = vmul.f32 1.442695, %v650_v34 }
 0x1ba   : > { %v1133_v41 = vpop.eup %1132  ;;  %v718_v43 = vsub.f32 %v1458_v32, %v1462_v35  ;;  %1152 = vpow2.f32 %v711_v36  ;;  %v593_v27 = vsel %vm591_vm10, %v1426_v56, %v525_v25  ;;  %v526_v29 = vsel %vm524_vm11, %v1430_v60, 0.0 }
 0x1bb   : > { %v1135_v44 = vpop.eup %1134  ;;  %v513_v45 = vmul.f32 0.0, %v1133_v41  ;;  %1154 = vpow2.f32 %v645_v39  ;;  %v713_v46 = vmul.f32 1.442695, %v710_v40  ;;  %v659_v30 = vsel %vm657_vm12, %v1441_v10, %v593_v27 }
 0x1bc   : > { %1156 = vpow2.f32 %v719_v38  ;;  %v721_v49 = vmul.f32 1.442695, %v718_v43  ;;  %v594_v33 = vsel %vm592_vm13, %v1437_v3, %v526_v29  ;;  %v727_v34 = vsel %vm725_vm14, %v1446_v16, %v659_v30 }
 0x1bd   : > { %v521_v47 = vadd.f32 %v1135_v44, %v513_v45  ;;  %1158 = vpow2.f32 %v653_v42  ;;  %v660_v56 = vsel %vm658_vm15, %v1452_v23, %v594_v33  ;;  %v760_v23 = vpop.xlane.xlu1 %759 }
 0x1be   : > { %v1137_v48 = vpop.eup %1136  ;;  %1160 = vpow2.f32 %v713_v46  ;;  %v728_v10 = vsel %vm726_vm0, %v1458_v32, %v660_v56  ;;  %v761_v42 = vrot.slane %v760_v23, 4 }
 0x1bf   : > { %v1139_v50 = vpop.eup %1138  ;;  %v581_v53 = vmul.f32 %v1137_v48, %v521_v47  ;;  %1162 = vpow2.f32 %v721_v49 }
 0x1c0   : > { %v1141_v54 = vpop.eup %1140  ;;  %v762_v44 = vadd.f32 %v761_v42, %v760_v23 }
 0x1c1   : > { %v1143_v55 = vpop.eup %1142  ;;  %v514_v57 = vmul.f32 0.0, %v1141_v54  ;;  %v589_v59 = vadd.f32 %v1139_v50, %v581_v53 }
 0x1c2   : > { %v1145_v58 = vpop.eup %1144  ;;  %v763_v46 = vrot.slane %v762_v44, 2 }
 0x1c3   : > { %v522_v61 = vadd.f32 %v1143_v55, %v514_v57 }
 0x1c4   : > { %v1147_v62 = vpop.eup %1146  ;;  %v764_v54 = vadd.f32 %v763_v46, %v762_v44 }
 0x1c5   : > { %v582_v63 = vmul.f32 %v1145_v58, %v522_v61  ;;  %v647_v0 = vmul.f32 %v1147_v62, %v589_v59  ;;  %v1149_v1 = vpop.eup %1148 }
 0x1c6   : > { %v1151_v2 = vpop.eup %1150  ;;  %v765_v62 = vrot.slane %v764_v54, 1 }
 0x1c7   : > { %v655_v4 = vadd.f32 %v1149_v1, %v647_v0  ;;  %v1153_v5 = vpop.eup %1152  ;;  %v590_v6 = vadd.f32 %v1151_v2, %v582_v63 }
 0x1c8   : > { %v1155_v7 = vpop.eup %1154 }
 0x1c9   : > { %v715_v8 = vmul.f32 %v1153_v5, %v655_v4  ;;  %v1157_v9 = vpop.eup %1156  ;;  %v648_v11 = vmul.f32 %v1155_v7, %v590_v6  ;;  %v766_v6 = vadd.f32 %v765_v62, %v764_v54 }
 0x1ca   : > { %v1159_v12 = vpop.eup %1158 }
 0x1cb   : > { %v723_v14 = vadd.f32 %v1157_v9, %v715_v8  ;;  %v656_v15 = vadd.f32 %v1159_v12, %v648_v11  ;;  %v1161_v17 = vpop.eup %1160 }
 0x1cc   : > { %v1163_v21 = vpop.eup %1162 }
 0x1cd   : > { %1164 = vlog2.f32 %v723_v14  ;;  %v716_v20 = vmul.f32 %v1161_v17, %v656_v15 }
 0x1cf   : > { %v724_v24 = vadd.f32 %v1163_v21, %v716_v20 }
 0x1d1   : > { %1166 = vlog2.f32 %v724_v24 }
 0x1d3   : > { %v811_v41 = vpop.xlane.xlu1 %810 }
 0x1d4   : > { %v812_v43 = vrot.slane %v811_v41, 4 }
 0x1d6   : > { %v813_v45 = vadd.f32 %v812_v43, %v811_v41 }
 0x1d8   : > { %v814_v49 = vrot.slane %v813_v45, 2 }
 0x1da   : > { %v1165_v26 = vpop.eup %1164  ;;  %v815_v58 = vadd.f32 %v814_v49, %v813_v45 }
 0x1db   : > { %v730_v28 = vmul.f32 0.6931472, %v1165_v26 }
 0x1dc   : > { %v816_v2 = vrot.slane %v815_v58, 1 }
 0x1dd   : > { %v733_v52 = vadd.f32 %v730_v28, %v1450_v22 }
 0x1de   : > { %v1167_v31 = vpop.eup %1166  ;;  %v817_v9 = vadd.f32 %v816_v2, %v815_v58 }
 0x1df   : > { %v735_v36 = vsub.f32 %v733_v52, %v727_v34  ;;  %v732_v60 = vmul.f32 0.6931472, %v1167_v31 }
 0x1e1   : > { %v734_v37 = vadd.f32 %v732_v60, %v1462_v35  ;;  %v737_v22 = vsel %vm453_vm5, %v735_v36, 0.0  ;;  %v798_v35 = vpop.xlane.xlu1 %797  ;;  %vm841_vm5 = vcmp.eq.s32.totalorder %v1377_v13, 4 }
 0x1e2   : > { %v740_v3 = vsel %vm739_vm7, %v737_v22, 0.0  ;;  %v799_v32 = vrot.slane %v798_v35, 4 }
 0x1e3   : > { %v736_v38 = vsub.f32 %v734_v37, %v728_v10 }
 0x1e4   : > { %v800_v18 = vadd.f32 %v799_v32, %v798_v35 }
 0x1e5   : > { %v738_v39 = vsel %vm454_vm6, %v736_v38, 0.0  ;;  %vm844_vm6 = vcmask 57344  }
 0x1e6   : > { %v741_v16 = vsel %vm739_vm7, %v738_v39, 0.0  ;;  %v801_v47 = vrot.slane %v800_v18, 2 }
 0x1e7   : > { %v742_v40 = vadd.f32 %v741_v16, %v740_v3 }
 0x1e9   : > { %743 = vadd.xlane.f32.xlu1 %v742_v40 }
 0x1ed   : > { %820 = vadd.xlane.f32.xlu1 %v1419_v51  ;;  %v802_v51 = vadd.f32 %v801_v47, %v800_v18 }
 0x1ef   : > { %v803_v1 = vrot.slane %v802_v51, 1 }
 0x1f1   : > { %v804_v7 = vadd.f32 %v803_v1, %v802_v51 }
 0x272   : > { %v744_v19 = vpop.xlane.xlu1 %743 }
 0x273   : > { %v745_v48 = vrot.slane %v744_v19, 4 }
 0x275   : > { %v746_v50 = vadd.f32 %v745_v48, %v744_v19 }
 0x276   : > { %v821_v53 = vpop.xlane.xlu1 %820 }
 0x277   : > { %v747_v55 = vrot.slane %v746_v50, 2  ;;  %v822_v57 = vrot.slane %v821_v53, 4 }
 0x279   : > { %v823_v59 = vadd.f32 %v822_v57, %v821_v53  ;;  %v748_v61 = vadd.f32 %v747_v55, %v746_v50 }
 0x27b   : > { %v824_v63 = vrot.slane %v823_v59, 2  ;;  %v749_v0 = vrot.slane %v748_v61, 1 }
 0x27d   : > { %v825_v4 = vadd.f32 %v824_v63, %v823_v59  ;;  %v750_v5 = vadd.f32 %v749_v0, %v748_v61 }
 0x27f   : > { %1056 = vpush %v750_v5  ;;  %v826_v8 = vrot.slane %v825_v4, 1 }
 0x280   : > { %1058 = vpush %v766_v6 }
 0x281   : > { %1060 = vpush %v804_v7  ;;  %v827_v11 = vadd.f32 %v826_v8, %v825_v4 }
 0x282   : > { %1062 = vpush %v817_v9 }
 0x283   : > { %1064 = vpush %v827_v11 }
 0x2b0   : > { %s1057_s18 = spop %1056 }
 0x2b1   : > { %v830_v12 = vstv %s1057_s18  ;;  %s1059_s19 = spop %1058  ;;  %s1172_s18 = sshll.u32 %s1249_s16, 4  ;;  %s1173_s18 = int_to_ptr.vmem [resolvable:$false] %s1172_s18 }
 0x2b2   : > { %v831_v14 = vsel %vm829_vm1, %v830_v12, 0.0  ;;  %v833_v15 = vstv %s1059_s19  ;;  %s1061_s27 = spop %1060  ;;  %s1174_s19 = scalar_lea.vmem %s1173_s18, 32 }
 0x2b3   : > { %v834_v17 = vsel %vm832_vm2, %v833_v15, %v831_v14  ;;  %v836_v20 = vstv %s1061_s27  ;;  %s1063_s8 = spop %1062  ;;  %p1175_p1 = scmp.lt.s32.totalorder %s861_s30, %s1173_s18 }
 0x2b4   : > { %v837_v21 = vsel %vm835_vm3, %v836_v20, %v834_v17  ;;  %v839_v24 = vstv %s1063_s8  ;;  %s1065_s11 = spop %1064  ;;  %p1176_p2 = scmp.lt.s32.totalorder %s1174_s19, %s1168_s13 }
 0x2b5   : > { %v840_v25 = vsel %vm838_vm4, %v839_v24, %v837_v21  ;;  %v842_v26 = vstv %s1065_s11 }
 0x2b6   : > { %v843_v27 = vsel %vm841_vm5, %v842_v26, %v840_v25  ;;  %p1177_p3 = por %p1176_p2, %p1175_p1 }
 0x2b7   : > { %845 = vst.msk [vmem:[%s335_s28] sm:$0x1] %vm844_vm6, %v843_v27 }
 0x2b8   : > { %p1178_p5 = pnand %p1177_p3, %p1171_p0 }
 0x2ba   : > { %1181 = shalt.err (!%p1178_p5)
}
 0x2bb   : > { %s1182_s20 = scalar_lea.hbm %s1502_s14, 16  ;;  %s1186_s28 = scalar_lea.hbm %s1548_s6, 32 }
 0x2bc   : > { %p1183_p6 = scmp.ne.s32.totalorder %s1502_s14, %s1182_s20  ;;  %p1187_p10 = scmp.lt.s32.totalorder %s1502_s14, %s1548_s6 }
 0x2bd   : > { %p1188_p11 = scmp.lt.s32.totalorder %s1186_s28, %s1182_s20 }
 0x2be   : > { %p1184_p7 = pnand %p1183_p6, %p1325_p4 }
 0x2bf   : > { %p1189_p12 = por %p1188_p11, %p1187_p10 }
 0x2c0   : > { %p1185_p9 = pneg %p1184_p7 }
 0x2c2   : > { %p1190_p13 = pnand %p1189_p12, %p1185_p9 }
 0x2c4   : > { %1193 = shalt.err (!%p1190_p13)
}
 0x2c5   : > { %1066 = dma.vmem_to_hbm [thread:$0]  (%p1325_p4), %s861_s30, 16, %s1502_s14, %s847_s15  }
 0x2c6 PF: > { %p1072_p0 = scmp.ge.s32.totalorder %s1244_s26, 2  ;;  %s872_s24 = sand.u32 1, %s1224_s21  }
 0x2c7   : > { %s873_s12 = scalar_lea.sflag [#allocation3], %s872_s24 }
 0x2c8   : > { %p1069_p1 = pnand %p1072_p0, %p1332_p8 }
 0x2ca   : > { %p1070_p2 = pneg %p1069_p1 }
 0x2cc   : > { %1219 = dma.done.wait (%p1070_p2), %s873_s12, 16  }
 0x2cd   : > { %1221 = vsyncadd (%p1070_p2), %s873_s12, 4294967280  ;;  %s19_s26 = sadd.s32 1, %s1244_s26   ;;  %s1551_s21 = smov %s1228_s22 }
 0x2ce   : > { %p16_p3 = scmp.ge.s32.totalorder %s19_s26, 4   ;;  %s1552_s22 = smov %s1232_s23 }
 0x2cf   : > { %s1553_s23 = smov %s1338_s10  ;;  %s1554_s24 = smov %s1240_s25 }
 0x2d0   : > { %s1555_s25 = smov %s1557_s29  ;;  %18 = sbr.rel (!%p16_p3) target bundleno = 4 (0x4), region = 91 }
 0x2d5   :  { %877 = vsyncpa [#allocation3], 1 }
 0x2d6   :  { %879 = vsyncpa [#allocation3 + $0x1], 1 }

</bundles_post_ra>
